<compile_context>
chip_gen: v7x
topology: tpu7x:2x2x1
jax: 0.10.0
libtpu: 0.0.40
codegen_flags: <defaults>
</compile_context>

<pallas_src>
import jax
import jax.numpy as jnp
from jax.experimental import pallas as pl
from jax.experimental.pallas import tpu as pltpu


def _make_encoder_kernel(seq_len, batch, h_dim):
    """Build a kernel body with static seq_len / batch / h_dim."""

    def kernel(x_ref, wx_ref, bx_ref, whh_ref, out_ref, xp_sc):
        # Hoisted, non-recurrent input projection for every timestep at once:
        #   xp[t*B:(t+1)*B, :] = x_t @ Wx + bx
        # Single (T*B, in) @ (in, 4h) matmul -> off the serial critical path.
        xp_sc[...] = (
            jnp.dot(x_ref[...], wx_ref[...], preferred_element_type=jnp.float32)
            + bx_ref[...]
        )

        h = jnp.zeros((batch, h_dim), jnp.float32)
        c = jnp.zeros((batch, h_dim), jnp.float32)

        # Statically unrolled recurrence: only h @ Whh^T is serial.
        for t in range(seq_len):
            gates = (
                xp_sc[pl.ds(t * batch, batch), :]
                + jnp.dot(h, whh_ref[...], preferred_element_type=jnp.float32)
            )  # (batch, 4*h_dim), PyTorch gate order i, f, g, o
            i_g = jax.nn.sigmoid(gates[:, 0 * h_dim:1 * h_dim])
            f_g = jax.nn.sigmoid(gates[:, 1 * h_dim:2 * h_dim])
            g_g = jnp.tanh(gates[:, 2 * h_dim:3 * h_dim])
            o_g = jax.nn.sigmoid(gates[:, 3 * h_dim:4 * h_dim])
            c = f_g * c + i_g * g_g
            h = o_g * jnp.tanh(c)

        out_ref[...] = h.astype(out_ref.dtype)

    return kernel


def encoder_forward(obs_traj, params):
    """obs_traj: (seq_len, batch, input_dim) f32. Returns (1, batch, h_dim)."""
    seq_len, batch, input_dim = obs_traj.shape
    w_emb = params["w_emb"]                 # (emb, in)      nn.Linear weight
    b_emb = params["b_emb"]                 # (emb,)         nn.Linear bias
    w_ih = params["w_ih"]                   # (4h, emb)      LSTM weight_ih_l0
    w_hh = params["w_hh"]                   # (4h, h)        LSTM weight_hh_l0
    b = params["b_ih"] + params["b_hh"]     # (4h,)          folded LSTM biases
    h_dim = w_hh.shape[1]

    # One-time host-side folding of the (linear) spatial embedding into the
    # input->hidden projection:
    #   (x @ Wemb^T + bemb) @ Wih^T + b  ==  x @ (Wih @ Wemb)^T + (bemb @ Wih^T + b)
    wx = (w_ih @ w_emb).T                   # (input_dim, 4h)
    bx = (b_emb @ w_ih.T + b)[None, :]      # (1, 4h)
    whh_t = w_hh.T                          # (h, 4h)

    # Collapse time into the row axis (the PyTorch module does the same view()).
    x2d = obs_traj.reshape(seq_len * batch, input_dim)

    kernel = _make_encoder_kernel(seq_len, batch, h_dim)

    def vmem_spec():
        return pl.BlockSpec(memory_space=pltpu.MemorySpace.VMEM)

    final_h = pl.pallas_call(
        kernel,
        out_shape=jax.ShapeDtypeStruct((batch, h_dim), jnp.float32),
        in_specs=[vmem_spec(), vmem_spec(), vmem_spec(), vmem_spec()],
        out_specs=vmem_spec(),
        scratch_shapes=[
            pltpu.VMEM((seq_len * batch, 4 * h_dim), jnp.float32),  # xp scratch
        ],
    )(x2d, wx, bx, whh_t)

    # TODO(synk): only num_layers=1 (module default) is implemented.
    return final_h[None, :, :]   # (num_layers=1, batch, h_dim)


def make_params(key, input_dim, embedding_dim, h_dim):
    """Deterministic synthetic parameters matching PyTorch module shapes."""
    ks = jax.random.split(key, 6)
    scale = 0.1
    return {
        # nn.Linear(input_dim, embedding_dim): weight (emb, in), bias (emb,)
        "w_emb": scale * jax.random.normal(ks[0], (embedding_dim, input_dim), jnp.float32),
        "b_emb": scale * jax.random.normal(ks[1], (embedding_dim,), jnp.float32),
        # nn.LSTM(emb, h, 1): W_ih (4h, emb), W_hh (4h, h), b_ih (4h,), b_hh (4h,)
        "w_ih": scale * jax.random.normal(ks[2], (4 * h_dim, embedding_dim), jnp.float32),
        "w_hh": scale * jax.random.normal(ks[3], (4 * h_dim, h_dim), jnp.float32),
        "b_ih": scale * jax.random.normal(ks[4], (4 * h_dim,), jnp.float32),
        "b_hh": scale * jax.random.normal(ks[5], (4 * h_dim,), jnp.float32),
    }


def encoder_ref(obs_traj, params):
    """Pure-JAX reference in the original (unfolded) PyTorch formulation."""
    seq_len, batch, _ = obs_traj.shape
    h_dim = params["w_hh"].shape[1]
    e = obs_traj @ params["w_emb"].T + params["b_emb"]   # (T, B, emb)

    def step(carry, e_t):
        h, c = carry
        gates = (e_t @ params["w_ih"].T + h @ params["w_hh"].T
                 + params["b_ih"] + params["b_hh"])
        i, f, g, o = jnp.split(gates, 4, axis=-1)
        c = jax.nn.sigmoid(f) * c + jax.nn.sigmoid(i) * jnp.tanh(g)
        h = jax.nn.sigmoid(o) * jnp.tanh(c)
        return (h, c), None

    h0 = jnp.zeros((batch, h_dim), jnp.float32)
    (h, _), _ = jax.lax.scan(step, (h0, h0), e)
    return h[None, :, :]


if __name__ == "__main__":
    # Small shapes: seq=8, batch=8 pedestrians, input_dim=2 (xy coords, as in
    # Social-GAN), embedding_dim=64, h_dim=64 (module defaults).
    seq_len, batch, input_dim = 8, 8, 2
    embedding_dim, h_dim = 64, 64

    key = jax.random.PRNGKey(0)
    k_x, k_p = jax.random.split(key)
    obs_traj = jax.random.normal(k_x, (seq_len, batch, input_dim), jnp.float32)
    params = make_params(k_p, input_dim, embedding_dim, h_dim)

    final_h = encoder_forward(obs_traj, params)
    final_h = jax.block_until_ready(final_h)

    ref = encoder_ref(obs_traj, params)
    assert final_h.shape == (1, batch, h_dim)
    assert jnp.allclose(final_h, ref, atol=1e-4, rtol=1e-4), "mismatch vs reference"

    print("KERNEL_OK")
</pallas_src>

<mosaic_0001>
module attributes {stable_mosaic.version = 11 : i64} {
  func.func @kernel(%arg0: memref<64x2xf32, #tpu.memory_space<vmem>>, %arg1: memref<2x256xf32, #tpu.memory_space<vmem>>, %arg2: memref<1x256xf32, #tpu.memory_space<vmem>>, %arg3: memref<64x256xf32, #tpu.memory_space<vmem>>, %arg4: memref<8x64xf32, #tpu.memory_space<vmem>>, %arg5: memref<64x256xf32, #tpu.memory_space<vmem>>) attributes {dimension_semantics = [], scalar_prefetch = 0 : i64, scratch_operands = 1 : i64, tpu.core_type = #tpu.core_type<tc>} {
    %c0 = arith.constant 0 : index
    %c0_0 = arith.constant 0 : index
    %0 = vector.load %arg0[%c0, %c0_0] : memref<64x2xf32, #tpu.memory_space<vmem>>, vector<64x2xf32>
    %c0_1 = arith.constant 0 : index
    %c0_2 = arith.constant 0 : index
    %1 = vector.load %arg1[%c0_1, %c0_2] : memref<2x256xf32, #tpu.memory_space<vmem>>, vector<2x256xf32>
    %cst = arith.constant dense<0.000000e+00> : vector<64x256xf32>
    %2 = tpu.matmul %0, %1, %cst {dimension_numbers = #tpu.dot_dimension_numbers<[1], [0], [0], [1], [0, 0, 1, 1], [], []>} : vector<64x2xf32>, vector<2x256xf32>, vector<64x256xf32> -> vector<64x256xf32>
    %c0_3 = arith.constant 0 : index
    %c0_4 = arith.constant 0 : index
    %3 = vector.load %arg2[%c0_3, %c0_4] : memref<1x256xf32, #tpu.memory_space<vmem>>, vector<1x256xf32>
    %4 = vector.broadcast %3 : vector<1x256xf32> to vector<64x256xf32>
    %5 = arith.addf %2, %4 : vector<64x256xf32>
    %c0_5 = arith.constant 0 : index
    %c0_6 = arith.constant 0 : index
    %6 = vector.load %arg5[%c0_5, %c0_6] : memref<64x256xf32, #tpu.memory_space<vmem>>, vector<64x256xf32>
    tpu.vector_store %arg5[%c0_5, %c0_6], %5 {strides = array<i32>} : memref<64x256xf32, #tpu.memory_space<vmem>>, vector<64x256xf32>,
    %cst_7 = arith.constant 0.000000e+00 : f32
    %7 = vector.broadcast %cst_7 : f32 to vector<8x64xf32>
    %cst_8 = arith.constant 0.000000e+00 : f32
    %8 = vector.broadcast %cst_8 : f32 to vector<8x64xf32>
    %c0_9 = arith.constant 0 : index
    %c0_10 = arith.constant 0 : index
    %9 = vector.load %arg5[%c0_9, %c0_10] : memref<64x256xf32, #tpu.memory_space<vmem>>, vector<8x256xf32>
    %c0_11 = arith.constant 0 : index
    %c0_12 = arith.constant 0 : index
    %10 = vector.load %arg3[%c0_11, %c0_12] : memref<64x256xf32, #tpu.memory_space<vmem>>, vector<64x256xf32>
    %cst_13 = arith.constant dense<0.000000e+00> : vector<8x256xf32>
    %11 = tpu.matmul %7, %10, %cst_13 {dimension_numbers = #tpu.dot_dimension_numbers<[1], [0], [0], [1], [0, 0, 1, 1], [], []>} : vector<8x64xf32>, vector<64x256xf32>, vector<8x256xf32> -> vector<8x256xf32>
    %12 = arith.addf %9, %11 : vector<8x256xf32>
    %13 = vector.extract_strided_slice %12 {offsets = [0, 0], sizes = [8, 64], strides = [1, 1]} : vector<8x256xf32> to vector<8x64xf32>
    %14 = arith.negf %13 : vector<8x64xf32>
    %15 = math.exp %14 : vector<8x64xf32>
    %cst_14 = arith.constant 1.000000e+00 : f32
    %16 = vector.broadcast %cst_14 : f32 to vector<8x64xf32>
    %17 = arith.addf %16, %15 : vector<8x64xf32>
    %18 = arith.divf %16, %17 : vector<8x64xf32>
    %19 = vector.extract_strided_slice %12 {offsets = [0, 64], sizes = [8, 64], strides = [1, 1]} : vector<8x256xf32> to vector<8x64xf32>
    %20 = arith.negf %19 : vector<8x64xf32>
    %21 = math.exp %20 : vector<8x64xf32>
    %cst_15 = arith.constant 1.000000e+00 : f32
    %22 = vector.broadcast %cst_15 : f32 to vector<8x64xf32>
    %23 = arith.addf %22, %21 : vector<8x64xf32>
    %24 = arith.divf %22, %23 : vector<8x64xf32>
    %25 = vector.extract_strided_slice %12 {offsets = [0, 128], sizes = [8, 64], strides = [1, 1]} : vector<8x256xf32> to vector<8x64xf32>
    %26 = math.tanh %25 : vector<8x64xf32>
    %27 = vector.extract_strided_slice %12 {offsets = [0, 192], sizes = [8, 64], strides = [1, 1]} : vector<8x256xf32> to vector<8x64xf32>
    %28 = arith.negf %27 : vector<8x64xf32>
    %29 = math.exp %28 : vector<8x64xf32>
    %cst_16 = arith.constant 1.000000e+00 : f32
    %30 = vector.broadcast %cst_16 : f32 to vector<8x64xf32>
    %31 = arith.addf %30, %29 : vector<8x64xf32>
    %32 = arith.divf %30, %31 : vector<8x64xf32>
    %33 = arith.mulf %24, %8 : vector<8x64xf32>
    %34 = arith.mulf %18, %26 : vector<8x64xf32>
    %35 = arith.addf %33, %34 : vector<8x64xf32>
    %36 = math.tanh %35 : vector<8x64xf32>
    %37 = arith.mulf %32, %36 : vector<8x64xf32>
    %c8 = arith.constant 8 : index
    %c0_17 = arith.constant 0 : index
    %38 = vector.load %arg5[%c8, %c0_17] : memref<64x256xf32, #tpu.memory_space<vmem>>, vector<8x256xf32>
    %c0_18 = arith.constant 0 : index
    %c0_19 = arith.constant 0 : index
    %39 = vector.load %arg3[%c0_18, %c0_19] : memref<64x256xf32, #tpu.memory_space<vmem>>, vector<64x256xf32>
    %cst_20 = arith.constant dense<0.000000e+00> : vector<8x256xf32>
    %40 = tpu.matmul %37, %39, %cst_20 {dimension_numbers = #tpu.dot_dimension_numbers<[1], [0], [0], [1], [0, 0, 1, 1], [], []>} : vector<8x64xf32>, vector<64x256xf32>, vector<8x256xf32> -> vector<8x256xf32>
    %41 = arith.addf %38, %40 : vector<8x256xf32>
    %42 = vector.extract_strided_slice %41 {offsets = [0, 0], sizes = [8, 64], strides = [1, 1]} : vector<8x256xf32> to vector<8x64xf32>
    %43 = arith.negf %42 : vector<8x64xf32>
    %44 = math.exp %43 : vector<8x64xf32>
    %cst_21 = arith.constant 1.000000e+00 : f32
    %45 = vector.broadcast %cst_21 : f32 to vector<8x64xf32>
    %46 = arith.addf %45, %44 : vector<8x64xf32>
    %47 = arith.divf %45, %46 : vector<8x64xf32>
    %48 = vector.extract_strided_slice %41 {offsets = [0, 64], sizes = [8, 64], strides = [1, 1]} : vector<8x256xf32> to vector<8x64xf32>
    %49 = arith.negf %48 : vector<8x64xf32>
    %50 = math.exp %49 : vector<8x64xf32>
    %cst_22 = arith.constant 1.000000e+00 : f32
    %51 = vector.broadcast %cst_22 : f32 to vector<8x64xf32>
    %52 = arith.addf %51, %50 : vector<8x64xf32>
    %53 = arith.divf %51, %52 : vector<8x64xf32>
    %54 = vector.extract_strided_slice %41 {offsets = [0, 128], sizes = [8, 64], strides = [1, 1]} : vector<8x256xf32> to vector<8x64xf32>
    %55 = math.tanh %54 : vector<8x64xf32>
    %56 = vector.extract_strided_slice %41 {offsets = [0, 192], sizes = [8, 64], strides = [1, 1]} : vector<8x256xf32> to vector<8x64xf32>
    %57 = arith.negf %56 : vector<8x64xf32>
    %58 = math.exp %57 : vector<8x64xf32>
    %cst_23 = arith.constant 1.000000e+00 : f32
    %59 = vector.broadcast %cst_23 : f32 to vector<8x64xf32>
    %60 = arith.addf %59, %58 : vector<8x64xf32>
    %61 = arith.divf %59, %60 : vector<8x64xf32>
    %62 = arith.mulf %53, %35 : vector<8x64xf32>
    %63 = arith.mulf %47, %55 : vector<8x64xf32>
    %64 = arith.addf %62, %63 : vector<8x64xf32>
    %65 = math.tanh %64 : vector<8x64xf32>
    %66 = arith.mulf %61, %65 : vector<8x64xf32>
    %c16 = arith.constant 16 : index
    %c0_24 = arith.constant 0 : index
    %67 = vector.load %arg5[%c16, %c0_24] : memref<64x256xf32, #tpu.memory_space<vmem>>, vector<8x256xf32>
    %c0_25 = arith.constant 0 : index
    %c0_26 = arith.constant 0 : index
    %68 = vector.load %arg3[%c0_25, %c0_26] : memref<64x256xf32, #tpu.memory_space<vmem>>, vector<64x256xf32>
    %cst_27 = arith.constant dense<0.000000e+00> : vector<8x256xf32>
    %69 = tpu.matmul %66, %68, %cst_27 {dimension_numbers = #tpu.dot_dimension_numbers<[1], [0], [0], [1], [0, 0, 1, 1], [], []>} : vector<8x64xf32>, vector<64x256xf32>, vector<8x256xf32> -> vector<8x256xf32>
    %70 = arith.addf %67, %69 : vector<8x256xf32>
    %71 = vector.extract_strided_slice %70 {offsets = [0, 0], sizes = [8, 64], strides = [1, 1]} : vector<8x256xf32> to vector<8x64xf32>
    %72 = arith.negf %71 : vector<8x64xf32>
    %73 = math.exp %72 : vector<8x64xf32>
    %cst_28 = arith.constant 1.000000e+00 : f32
    %74 = vector.broadcast %cst_28 : f32 to vector<8x64xf32>
    %75 = arith.addf %74, %73 : vector<8x64xf32>
    %76 = arith.divf %74, %75 : vector<8x64xf32>
    %77 = vector.extract_strided_slice %70 {offsets = [0, 64], sizes = [8, 64], strides = [1, 1]} : vector<8x256xf32> to vector<8x64xf32>
    %78 = arith.negf %77 : vector<8x64xf32>
    %79 = math.exp %78 : vector<8x64xf32>
    %cst_29 = arith.constant 1.000000e+00 : f32
    %80 = vector.broadcast %cst_29 : f32 to vector<8x64xf32>
    %81 = arith.addf %80, %79 : vector<8x64xf32>
    %82 = arith.divf %80, %81 : vector<8x64xf32>
    %83 = vector.extract_strided_slice %70 {offsets = [0, 128], sizes = [8, 64], strides = [1, 1]} : vector<8x256xf32> to vector<8x64xf32>
    %84 = math.tanh %83 : vector<8x64xf32>
    %85 = vector.extract_strided_slice %70 {offsets = [0, 192], sizes = [8, 64], strides = [1, 1]} : vector<8x256xf32> to vector<8x64xf32>
    %86 = arith.negf %85 : vector<8x64xf32>
    %87 = math.exp %86 : vector<8x64xf32>
    %cst_30 = arith.constant 1.000000e+00 : f32
    %88 = vector.broadcast %cst_30 : f32 to vector<8x64xf32>
    %89 = arith.addf %88, %87 : vector<8x64xf32>
    %90 = arith.divf %88, %89 : vector<8x64xf32>
    %91 = arith.mulf %82, %64 : vector<8x64xf32>
    %92 = arith.mulf %76, %84 : vector<8x64xf32>
    %93 = arith.addf %91, %92 : vector<8x64xf32>
    %94 = math.tanh %93 : vector<8x64xf32>
    %95 = arith.mulf %90, %94 : vector<8x64xf32>
    %c24 = arith.constant 24 : index
    %c0_31 = arith.constant 0 : index
    %96 = vector.load %arg5[%c24, %c0_31] : memref<64x256xf32, #tpu.memory_space<vmem>>, vector<8x256xf32>
    %c0_32 = arith.constant 0 : index
    %c0_33 = arith.constant 0 : index
    %97 = vector.load %arg3[%c0_32, %c0_33] : memref<64x256xf32, #tpu.memory_space<vmem>>, vector<64x256xf32>
    %cst_34 = arith.constant dense<0.000000e+00> : vector<8x256xf32>
    %98 = tpu.matmul %95, %97, %cst_34 {dimension_numbers = #tpu.dot_dimension_numbers<[1], [0], [0], [1], [0, 0, 1, 1], [], []>} : vector<8x64xf32>, vector<64x256xf32>, vector<8x256xf32> -> vector<8x256xf32>
    %99 = arith.addf %96, %98 : vector<8x256xf32>
    %100 = vector.extract_strided_slice %99 {offsets = [0, 0], sizes = [8, 64], strides = [1, 1]} : vector<8x256xf32> to vector<8x64xf32>
    %101 = arith.negf %100 : vector<8x64xf32>
    %102 = math.exp %101 : vector<8x64xf32>
    %cst_35 = arith.constant 1.000000e+00 : f32
    %103 = vector.broadcast %cst_35 : f32 to vector<8x64xf32>
    %104 = arith.addf %103, %102 : vector<8x64xf32>
    %105 = arith.divf %103, %104 : vector<8x64xf32>
    %106 = vector.extract_strided_slice %99 {offsets = [0, 64], sizes = [8, 64], strides = [1, 1]} : vector<8x256xf32> to vector<8x64xf32>
    %107 = arith.negf %106 : vector<8x64xf32>
    %108 = math.exp %107 : vector<8x64xf32>
    %cst_36 = arith.constant 1.000000e+00 : f32
    %109 = vector.broadcast %cst_36 : f32 to vector<8x64xf32>
    %110 = arith.addf %109, %108 : vector<8x64xf32>
    %111 = arith.divf %109, %110 : vector<8x64xf32>
    %112 = vector.extract_strided_slice %99 {offsets = [0, 128], sizes = [8, 64], strides = [1, 1]} : vector<8x256xf32> to vector<8x64xf32>
    %113 = math.tanh %112 : vector<8x64xf32>
    %114 = vector.extract_strided_slice %99 {offsets = [0, 192], sizes = [8, 64], strides = [1, 1]} : vector<8x256xf32> to vector<8x64xf32>
    %115 = arith.negf %114 : vector<8x64xf32>
    %116 = math.exp %115 : vector<8x64xf32>
    %cst_37 = arith.constant 1.000000e+00 : f32
    %117 = vector.broadcast %cst_37 : f32 to vector<8x64xf32>
    %118 = arith.addf %117, %116 : vector<8x64xf32>
    %119 = arith.divf %117, %118 : vector<8x64xf32>
    %120 = arith.mulf %111, %93 : vector<8x64xf32>
    %121 = arith.mulf %105, %113 : vector<8x64xf32>
    %122 = arith.addf %120, %121 : vector<8x64xf32>
    %123 = math.tanh %122 : vector<8x64xf32>
    %124 = arith.mulf %119, %123 : vector<8x64xf32>
    %c32 = arith.constant 32 : index
    %c0_38 = arith.constant 0 : index
    %125 = vector.load %arg5[%c32, %c0_38] : memref<64x256xf32, #tpu.memory_space<vmem>>, vector<8x256xf32>
    %c0_39 = arith.constant 0 : index
    %c0_40 = arith.constant 0 : index
    %126 = vector.load %arg3[%c0_39, %c0_40] : memref<64x256xf32, #tpu.memory_space<vmem>>, vector<64x256xf32>
    %cst_41 = arith.constant dense<0.000000e+00> : vector<8x256xf32>
    %127 = tpu.matmul %124, %126, %cst_41 {dimension_numbers = #tpu.dot_dimension_numbers<[1], [0], [0], [1], [0, 0, 1, 1], [], []>} : vector<8x64xf32>, vector<64x256xf32>, vector<8x256xf32> -> vector<8x256xf32>
    %128 = arith.addf %125, %127 : vector<8x256xf32>
    %129 = vector.extract_strided_slice %128 {offsets = [0, 0], sizes = [8, 64], strides = [1, 1]} : vector<8x256xf32> to vector<8x64xf32>
    %130 = arith.negf %129 : vector<8x64xf32>
    %131 = math.exp %130 : vector<8x64xf32>
    %cst_42 = arith.constant 1.000000e+00 : f32
    %132 = vector.broadcast %cst_42 : f32 to vector<8x64xf32>
    %133 = arith.addf %132, %131 : vector<8x64xf32>
    %134 = arith.divf %132, %133 : vector<8x64xf32>
    %135 = vector.extract_strided_slice %128 {offsets = [0, 64], sizes = [8, 64], strides = [1, 1]} : vector<8x256xf32> to vector<8x64xf32>
    %136 = arith.negf %135 : vector<8x64xf32>
    %137 = math.exp %136 : vector<8x64xf32>
    %cst_43 = arith.constant 1.000000e+00 : f32
    %138 = vector.broadcast %cst_43 : f32 to vector<8x64xf32>
    %139 = arith.addf %138, %137 : vector<8x64xf32>
    %140 = arith.divf %138, %139 : vector<8x64xf32>
    %141 = vector.extract_strided_slice %128 {offsets = [0, 128], sizes = [8, 64], strides = [1, 1]} : vector<8x256xf32> to vector<8x64xf32>
    %142 = math.tanh %141 : vector<8x64xf32>
    %143 = vector.extract_strided_slice %128 {offsets = [0, 192], sizes = [8, 64], strides = [1, 1]} : vector<8x256xf32> to vector<8x64xf32>
    %144 = arith.negf %143 : vector<8x64xf32>
    %145 = math.exp %144 : vector<8x64xf32>
    %cst_44 = arith.constant 1.000000e+00 : f32
    %146 = vector.broadcast %cst_44 : f32 to vector<8x64xf32>
    %147 = arith.addf %146, %145 : vector<8x64xf32>
    %148 = arith.divf %146, %147 : vector<8x64xf32>
    %149 = arith.mulf %140, %122 : vector<8x64xf32>
    %150 = arith.mulf %134, %142 : vector<8x64xf32>
    %151 = arith.addf %149, %150 : vector<8x64xf32>
    %152 = math.tanh %151 : vector<8x64xf32>
    %153 = arith.mulf %148, %152 : vector<8x64xf32>
    %c40 = arith.constant 40 : index
    %c0_45 = arith.constant 0 : index
    %154 = vector.load %arg5[%c40, %c0_45] : memref<64x256xf32, #tpu.memory_space<vmem>>, vector<8x256xf32>
    %c0_46 = arith.constant 0 : index
    %c0_47 = arith.constant 0 : index
    %155 = vector.load %arg3[%c0_46, %c0_47] : memref<64x256xf32, #tpu.memory_space<vmem>>, vector<64x256xf32>
    %cst_48 = arith.constant dense<0.000000e+00> : vector<8x256xf32>
    %156 = tpu.matmul %153, %155, %cst_48 {dimension_numbers = #tpu.dot_dimension_numbers<[1], [0], [0], [1], [0, 0, 1, 1], [], []>} : vector<8x64xf32>, vector<64x256xf32>, vector<8x256xf32> -> vector<8x256xf32>
    %157 = arith.addf %154, %156 : vector<8x256xf32>
    %158 = vector.extract_strided_slice %157 {offsets = [0, 0], sizes = [8, 64], strides = [1, 1]} : vector<8x256xf32> to vector<8x64xf32>
    %159 = arith.negf %158 : vector<8x64xf32>
    %160 = math.exp %159 : vector<8x64xf32>
    %cst_49 = arith.constant 1.000000e+00 : f32
    %161 = vector.broadcast %cst_49 : f32 to vector<8x64xf32>
    %162 = arith.addf %161, %160 : vector<8x64xf32>
    %163 = arith.divf %161, %162 : vector<8x64xf32>
    %164 = vector.extract_strided_slice %157 {offsets = [0, 64], sizes = [8, 64], strides = [1, 1]} : vector<8x256xf32> to vector<8x64xf32>
    %165 = arith.negf %164 : vector<8x64xf32>
    %166 = math.exp %165 : vector<8x64xf32>
    %cst_50 = arith.constant 1.000000e+00 : f32
    %167 = vector.broadcast %cst_50 : f32 to vector<8x64xf32>
    %168 = arith.addf %167, %166 : vector<8x64xf32>
    %169 = arith.divf %167, %168 : vector<8x64xf32>
    %170 = vector.extract_strided_slice %157 {offsets = [0, 128], sizes = [8, 64], strides = [1, 1]} : vector<8x256xf32> to vector<8x64xf32>
    %171 = math.tanh %170 : vector<8x64xf32>
    %172 = vector.extract_strided_slice %157 {offsets = [0, 192], sizes = [8, 64], strides = [1, 1]} : vector<8x256xf32> to vector<8x64xf32>
    %173 = arith.negf %172 : vector<8x64xf32>
    %174 = math.exp %173 : vector<8x64xf32>
    %cst_51 = arith.constant 1.000000e+00 : f32
    %175 = vector.broadcast %cst_51 : f32 to vector<8x64xf32>
    %176 = arith.addf %175, %174 : vector<8x64xf32>
    %177 = arith.divf %175, %176 : vector<8x64xf32>
    %178 = arith.mulf %169, %151 : vector<8x64xf32>
    %179 = arith.mulf %163, %171 : vector<8x64xf32>
    %180 = arith.addf %178, %179 : vector<8x64xf32>
    %181 = math.tanh %180 : vector<8x64xf32>
    %182 = arith.mulf %177, %181 : vector<8x64xf32>
    %c48 = arith.constant 48 : index
    %c0_52 = arith.constant 0 : index
    %183 = vector.load %arg5[%c48, %c0_52] : memref<64x256xf32, #tpu.memory_space<vmem>>, vector<8x256xf32>
    %c0_53 = arith.constant 0 : index
    %c0_54 = arith.constant 0 : index
    %184 = vector.load %arg3[%c0_53, %c0_54] : memref<64x256xf32, #tpu.memory_space<vmem>>, vector<64x256xf32>
    %cst_55 = arith.constant dense<0.000000e+00> : vector<8x256xf32>
    %185 = tpu.matmul %182, %184, %cst_55 {dimension_numbers = #tpu.dot_dimension_numbers<[1], [0], [0], [1], [0, 0, 1, 1], [], []>} : vector<8x64xf32>, vector<64x256xf32>, vector<8x256xf32> -> vector<8x256xf32>
    %186 = arith.addf %183, %185 : vector<8x256xf32>
    %187 = vector.extract_strided_slice %186 {offsets = [0, 0], sizes = [8, 64], strides = [1, 1]} : vector<8x256xf32> to vector<8x64xf32>
    %188 = arith.negf %187 : vector<8x64xf32>
    %189 = math.exp %188 : vector<8x64xf32>
    %cst_56 = arith.constant 1.000000e+00 : f32
    %190 = vector.broadcast %cst_56 : f32 to vector<8x64xf32>
    %191 = arith.addf %190, %189 : vector<8x64xf32>
    %192 = arith.divf %190, %191 : vector<8x64xf32>
    %193 = vector.extract_strided_slice %186 {offsets = [0, 64], sizes = [8, 64], strides = [1, 1]} : vector<8x256xf32> to vector<8x64xf32>
    %194 = arith.negf %193 : vector<8x64xf32>
    %195 = math.exp %194 : vector<8x64xf32>
    %cst_57 = arith.constant 1.000000e+00 : f32
    %196 = vector.broadcast %cst_57 : f32 to vector<8x64xf32>
    %197 = arith.addf %196, %195 : vector<8x64xf32>
    %198 = arith.divf %196, %197 : vector<8x64xf32>
    %199 = vector.extract_strided_slice %186 {offsets = [0, 128], sizes = [8, 64], strides = [1, 1]} : vector<8x256xf32> to vector<8x64xf32>
    %200 = math.tanh %199 : vector<8x64xf32>
    %201 = vector.extract_strided_slice %186 {offsets = [0, 192], sizes = [8, 64], strides = [1, 1]} : vector<8x256xf32> to vector<8x64xf32>
    %202 = arith.negf %201 : vector<8x64xf32>
    %203 = math.exp %202 : vector<8x64xf32>
    %cst_58 = arith.constant 1.000000e+00 : f32
    %204 = vector.broadcast %cst_58 : f32 to vector<8x64xf32>
    %205 = arith.addf %204, %203 : vector<8x64xf32>
    %206 = arith.divf %204, %205 : vector<8x64xf32>
    %207 = arith.mulf %198, %180 : vector<8x64xf32>
    %208 = arith.mulf %192, %200 : vector<8x64xf32>
    %209 = arith.addf %207, %208 : vector<8x64xf32>
    %210 = math.tanh %209 : vector<8x64xf32>
    %211 = arith.mulf %206, %210 : vector<8x64xf32>
    %c56 = arith.constant 56 : index
    %c0_59 = arith.constant 0 : index
    %212 = vector.load %arg5[%c56, %c0_59] : memref<64x256xf32, #tpu.memory_space<vmem>>, vector<8x256xf32>
    %c0_60 = arith.constant 0 : index
    %c0_61 = arith.constant 0 : index
    %213 = vector.load %arg3[%c0_60, %c0_61] : memref<64x256xf32, #tpu.memory_space<vmem>>, vector<64x256xf32>
    %cst_62 = arith.constant dense<0.000000e+00> : vector<8x256xf32>
    %214 = tpu.matmul %211, %213, %cst_62 {dimension_numbers = #tpu.dot_dimension_numbers<[1], [0], [0], [1], [0, 0, 1, 1], [], []>} : vector<8x64xf32>, vector<64x256xf32>, vector<8x256xf32> -> vector<8x256xf32>
    %215 = arith.addf %212, %214 : vector<8x256xf32>
    %216 = vector.extract_strided_slice %215 {offsets = [0, 0], sizes = [8, 64], strides = [1, 1]} : vector<8x256xf32> to vector<8x64xf32>
    %217 = arith.negf %216 : vector<8x64xf32>
    %218 = math.exp %217 : vector<8x64xf32>
    %cst_63 = arith.constant 1.000000e+00 : f32
    %219 = vector.broadcast %cst_63 : f32 to vector<8x64xf32>
    %220 = arith.addf %219, %218 : vector<8x64xf32>
    %221 = arith.divf %219, %220 : vector<8x64xf32>
    %222 = vector.extract_strided_slice %215 {offsets = [0, 64], sizes = [8, 64], strides = [1, 1]} : vector<8x256xf32> to vector<8x64xf32>
    %223 = arith.negf %222 : vector<8x64xf32>
    %224 = math.exp %223 : vector<8x64xf32>
    %cst_64 = arith.constant 1.000000e+00 : f32
    %225 = vector.broadcast %cst_64 : f32 to vector<8x64xf32>
    %226 = arith.addf %225, %224 : vector<8x64xf32>
    %227 = arith.divf %225, %226 : vector<8x64xf32>
    %228 = vector.extract_strided_slice %215 {offsets = [0, 128], sizes = [8, 64], strides = [1, 1]} : vector<8x256xf32> to vector<8x64xf32>
    %229 = math.tanh %228 : vector<8x64xf32>
    %230 = vector.extract_strided_slice %215 {offsets = [0, 192], sizes = [8, 64], strides = [1, 1]} : vector<8x256xf32> to vector<8x64xf32>
    %231 = arith.negf %230 : vector<8x64xf32>
    %232 = math.exp %231 : vector<8x64xf32>
    %cst_65 = arith.constant 1.000000e+00 : f32
    %233 = vector.broadcast %cst_65 : f32 to vector<8x64xf32>
    %234 = arith.addf %233, %232 : vector<8x64xf32>
    %235 = arith.divf %233, %234 : vector<8x64xf32>
    %236 = arith.mulf %227, %209 : vector<8x64xf32>
    %237 = arith.mulf %221, %229 : vector<8x64xf32>
    %238 = arith.addf %236, %237 : vector<8x64xf32>
    %239 = math.tanh %238 : vector<8x64xf32>
    %240 = arith.mulf %235, %239 : vector<8x64xf32>
    %c0_66 = arith.constant 0 : index
    %c0_67 = arith.constant 0 : index
    %241 = vector.load %arg4[%c0_66, %c0_67] : memref<8x64xf32, #tpu.memory_space<vmem>>, vector<8x64xf32>
    tpu.vector_store %arg4[%c0_66, %c0_67], %240 {strides = array<i32>} : memref<8x64xf32, #tpu.memory_space<vmem>>, vector<8x64xf32>,
    return
  }
}

</mosaic_0001>

<bundles_post_ra>
// kernel: tpu_custom_call.1
= control target key start
LH: loop header
LB: loop body
LE: loop exit
PB: predicated region body
PF: predicated region fallthrough
CT: control target
= control target key end

     0   :  { %9 = vsyncpa [#allocation4], 0  ;;  %s1680_s0 = inlined_call_operand.vmem [shape: f32[64,2], index: 0, kind: input, shape index: {}]   ;;  %s1681_s1 = inlined_call_operand.vmem [shape: f32[2,256], index: 1, kind: input, shape index: {}]   ;;  %s1682_s2 = inlined_call_operand.vmem [shape: f32[1,256], index: 2, kind: input, shape index: {}]   ;;  %s1683_s3 = inlined_call_operand.hbm [shape: f32[64,256], index: 3, kind: input, shape index: {}]   ;;  %s1684_s4 = inlined_call_operand.hbm [shape: f32[8,64], index: 4, kind: output, shape index: {}]  }
   0x1   :  { %10 = vsyncpa [#allocation5], 0  ;;  %s1416_s15 = smov [#allocation3]   ;;  %s1368_s19 = scalar_lea.hbm %s1683_s3, 2048 }
   0x2   :  { %s22_s16 = sshll.u32 %s1416_s15, 4  ;;  %p1369_p0 = scmp.ne.s32.totalorder %s1683_s3, %s1368_s19  ;;  %s23_s16 = int_to_ptr.vmem [resolvable:$true] %s22_s16 }
   0x3   :  { %p1372_p1 = scmp.lt.u32.totalorder %s1368_s19, %s1683_s3 }
   0x5   :  { %p1374_p2 = pnand %p1372_p1, %p1369_p0 }
   0x7   :  { %1377 = shalt.err (!%p1374_p2)
}
   0x8   :  { %s1378_s24 = scalar_lea.vmem %s23_s16, 2048  ;;  %p1383_p4 = scmp.lt.s32.totalorder %s23_s16, %s23_s16 }
   0x9   :  { %p1379_p3 = scmp.ne.s32.totalorder %s23_s16, %s1378_s24  ;;  %p1384_p5 = scmp.lt.s32.totalorder %s1378_s24, %s1378_s24 }
   0xb   :  { %p1385_p6 = por %p1384_p5, %p1383_p4 }
   0xd   :  { %p1386_p7 = pnand %p1385_p6, %p1379_p3 }
   0xf   :  { %1389 = shalt.err (!%p1386_p7)
}
  0x10   :  { %s1417_s25 = smov 256   ;;  %s1418_s26 = smov 16  }
  0x11   :  { %28 = dma.hbm_to_vmem [thread:$0]  %s1683_s3, 2048, %s23_s16, [#allocation4], %s1417_s25, %s1417_s25, %s1418_s26  }
  0x12   :  { %1412 = dma.done.wait [#allocation4], 2048  }
  0x13   :  { %1413 = vsyncadd [#allocation4], 4294965248  ;;  %v1419_v0 = vmov 0.0   ;;  %vm87_vm0 = vcmask 1041408   ;;  %v224_v2 = vld [vmem:[#allocation3 + $0x8] sm:$0xff]  ;;  %v226_v4 = vld [vmem:[#allocation3 + $0x18] sm:$0xff]  ;;  %v43_v39 = vlaneseq }
  0x14   :  { %156 = vmatprep.mubr.f32.mxu1 %v1419_v0  ;;  %613 = vmatprep.mubr.f32.mxu0 %v1419_v0  ;;  %v1072_v1 = vld.sshfl [vmem:[%s1681_s1] sm:$0x33 pattern:$0x76325410]  ;;  %v223_v5 = vld [vmem:[#allocation3] sm:$0xff]  ;;  %vm62_vm1 = vcmask 15360   ;;  %v1467_v8 = vpack.c.bf16 %v226_v4, %v224_v2 }
  0x15   :  { %v61_v3 = vcombine.high %v1072_v1, %v1072_v1  ;;  %v225_v6 = vld [vmem:[#allocation3 + $0x10] sm:$0xff]  ;;  %v228_v10 = vld [vmem:[#allocation3 + $0x28] sm:$0xff]  ;;  %v230_v11 = vld [vmem:[#allocation3 + $0x38] sm:$0xff]  ;;  %v44_v42 = vshrl.u32 %v43_v39, 7  ;;  %vm239_vm2 = vcmask 523264   ;;  %s1421_s20 = smov [#allocation6]  }
  0x16   :  { %v32_v7 = vld [vmem:[%s1680_s0] sm:$0xff]  ;;  %v1469_v9 = vpack.c.bf16 %v225_v6, %v223_v5  ;;  %v227_v12 = vld [vmem:[#allocation3 + $0x20] sm:$0xff]  ;;  %v1471_v14 = vpack.c.bf16 %v230_v11, %v228_v10  ;;  %v232_v15 = vld [vmem:[#allocation3 + $0x48] sm:$0xff]  ;;  %1155 = vmatprep.subr.bf16.mxu0 %v1467_v8  ;;  %s1063_s21 = sshll.u32 %s1421_s20, 4  ;;  %s1064_s21 = int_to_ptr.vmem [resolvable:$true] %s1063_s21 }
  0x17   :  { %1073 = vmatprep.subr.msk.mxu1 %vm87_vm0, %v61_v3  ;;  %v229_v13 = vld [vmem:[#allocation3 + $0x30] sm:$0xff]  ;;  %v234_v16 = vld [vmem:[#allocation3 + $0x58] sm:$0xff]  ;;  %v231_v20 = vld [vmem:[#allocation3 + $0x40] sm:$0xff]  ;;  %v45_v45 = vsub.s32 0, %v44_v42  ;;  %v49_v54 = vsub.s32 1, %v44_v42  ;;  %s1390_s22 = scalar_lea.vmem %s1064_s21, 128  ;;  %p1395_p9 = scmp.lt.s32.totalorder %s1064_s21, %s1064_s21 }
  0x18   :  { %1074 = vmatpush1.msk.msra.mxu1 %vm87_vm0, %v1072_v1  ;;  %v33_v17 = vld [vmem:[%s1680_s0 + $0x8] sm:$0xff]  ;;  %v1481_v18 = vpack.c.bf16 %v229_v13, %v227_v12  ;;  %v1484_v19 = vpack.c.bf16 %v234_v16, %v232_v15  ;;  %v233_v21 = vld [vmem:[#allocation3 + $0x50] sm:$0xff]  ;;  %1157 = vmatpush1.bf16.msra.mxu0 %v1469_v9  ;;  %v236_v22 = vld [vmem:[#allocation3 + $0x68] sm:$0xff]  ;;  %p1391_p8 = scmp.ne.s32.totalorder %s1064_s21, %s1390_s22  ;;  %p1396_p10 = scmp.lt.s32.totalorder %s1390_s22, %s1390_s22 }
  0x19   :  { %1075 = vmatmul.mubr.msk.f32.vlgmr.msra.gmra.mrb[0].mxu1 %vm62_vm1, %v32_v7  ;;  %1107 = vmatprep.subr.bf16.mxu1 %v1467_v8  ;;  %v238_v23 = vld [vmem:[#allocation3 + $0x78] sm:$0xff]  ;;  %v34_v24 = vld [vmem:[%s1680_s0 + $0x10] sm:$0xff]  ;;  %v1494_v25 = vpack.c.bf16 %v233_v21, %v231_v20  ;;  %v237_v28 = vld [vmem:[#allocation3 + $0x70] sm:$0xff] }
  0x1a   :  { %1109 = vmatpush1.bf16.msra.mxu1 %v1469_v9  ;;  %162 = vmatprep.mubr.f32.mxu1 %v1419_v0  ;;  %v1497_v26 = vpack.c.bf16 %v238_v23, %v236_v22  ;;  %v235_v27 = vld [vmem:[#allocation3 + $0x60] sm:$0xff]  ;;  %v35_v29 = vld [vmem:[%s1680_s0 + $0x18] sm:$0xff]  ;;  %v36_v31 = vld [vmem:[%s1680_s0 + $0x20] sm:$0xff]  ;;  %p1397_p11 = por %p1396_p10, %p1395_p9 }
  0x1b   :  { %1111 = vmatprep.subr.bf16.mxu1 %v1471_v14  ;;  %1159 = vmatprep.subr.bf16.mxu0 %v1471_v14  ;;  %v1507_v30 = vpack.c.bf16 %v237_v28, %v235_v27  ;;  %v37_v32 = vld [vmem:[%s1680_s0 + $0x28] sm:$0xff]  ;;  %v38_v33 = vld [vmem:[%s1680_s0 + $0x30] sm:$0xff]  ;;  %v39_v34 = vld [vmem:[%s1680_s0 + $0x38] sm:$0xff] }
  0x1c   :  { %1161 = vmatpush1.bf16.msra.mxu0 %v1481_v18  ;;  %v41_v46 = vld [vmem:[%s1682_s2] sm:$0x3]  ;;  %s1420_s2 = smov 64   ;;  %p1398_p12 = pnand %p1397_p11, %p1391_p8 }
  0x1d   :  { %1076 = vmatmul.mubr.msk.f32.gmra.mrb[2].mxu1 %vm62_vm1, %v33_v17  ;;  %1163 = vmatprep.subr.bf16.mxu0 %v1484_v19  ;;  %v1571_v49 = vrot.slane %v41_v46, %v45_v45  ;;  %v1574_v55 = vrot.slane %v41_v46, %v49_v54 }
  0x1e   :  { %168 = vmatprep.mubr.f32.mxu1 %v1419_v0  ;;  %1113 = vmatpush1.bf16.msra.mxu1 %v1481_v18 }
  0x1f   :  { %1115 = vmatprep.subr.bf16.mxu1 %v1484_v19 }
  0x20   :  { %1165 = vmatpush1.bf16.msra.mxu0 %v1494_v25 }
  0x21   :  { %1077 = vmatmul.mubr.msk.f32.gmra.mrb[4].mxu1 %vm62_vm1, %v34_v24  ;;  %1167 = vmatprep.subr.bf16.mxu0 %v1497_v26 }
  0x22   :  { %174 = vmatprep.mubr.f32.mxu1 %v1419_v0  ;;  %1117 = vmatpush1.bf16.msra.mxu1 %v1494_v25 }
  0x23   :  { %1119 = vmatprep.subr.bf16.mxu1 %v1497_v26 }
  0x24   :  { %1169 = vmatpush1.bf16.msra.mxu0 %v1507_v30 }
  0x25   :  { %1078 = vmatmul.mubr.msk.f32.gmra.mrb[6].mxu1 %vm62_vm1, %v35_v29  ;;  %1171 = vmatprep.subr.bf16.mxu0 %v1467_v8 }
  0x26   :  { %180 = vmatprep.mubr.f32.mxu1 %v1419_v0  ;;  %1121 = vmatpush1.bf16.msra.mxu1 %v1507_v30 }
  0x27   :  { %1123 = vmatprep.subr.bf16.mxu1 %v1467_v8 }
  0x29   :  { %1079 = vmatmul.mubr.msk.f32.gmra.mrb[8].mxu1 %vm62_vm1, %v36_v31 }
  0x2a   :  { %186 = vmatprep.mubr.f32.mxu1 %v1419_v0 }
  0x2d   :  { %1080 = vmatmul.mubr.msk.f32.gmra.mrb[10].mxu1 %vm62_vm1, %v37_v32 }
  0x2e   :  { %192 = vmatprep.mubr.f32.mxu1 %v1419_v0 }
  0x31   :  { %1081 = vmatmul.mubr.msk.f32.gmra.mrb[12].mxu1 %vm62_vm1, %v38_v33 }
  0x32   :  { %198 = vmatprep.mubr.f32.mxu1 %v1419_v0 }
  0x35   :  { %1082 = vmatmul.mubr.msk.f32.gmra.mrb[14].mxu1 %vm62_vm1, %v39_v34 }
  0x36   :  { %307 = vmatprep.mubr.f32.mxu1 %v1419_v0 }
  0x39   :  { %308 = vmatmul.mubr.f32.vlgmr.msra.gmra.mrb[0].mxu1 %v1419_v0 }
  0x3a   :  { %1125 = vmatpush1.bf16.msra.mxu1 %v1469_v9  ;;  %409 = vmatprep.mubr.f32.mxu1 %v1419_v0 }
  0x3b   :  { %1127 = vmatprep.subr.bf16.mxu1 %v1471_v14 }
  0x3e   :  { %1129 = vmatpush1.bf16.msra.mxu1 %v1481_v18 }
  0x3f   :  { %1131 = vmatprep.subr.bf16.mxu1 %v1484_v19 }
  0x42   :  { %1133 = vmatpush1.bf16.msra.mxu1 %v1494_v25 }
  0x43   :  { %1135 = vmatprep.subr.bf16.mxu1 %v1497_v26 }
  0x46   :  { %1137 = vmatpush1.bf16.msra.mxu1 %v1507_v30 }
  0x47   :  { %1139 = vmatprep.subr.bf16.mxu1 %v1467_v8 }
  0xf8   :  { %v1548_v35 = vpop.f32.mrb[6].mxu1 }
  0xf9   :  { %v1550_v36 = vpop.f32.mrb[7].mxu1 }
  0xfc   :  { %v1552_v37 = vpop.f32.mrb[8].mxu1 }
  0xfd   :  { %v1554_v38 = vpop.f32.mrb[9].mxu1 }
 0x100   :  { %v1556_v40 = vpop.f32.mrb[10].mxu1 }
 0x101   :  { %v1558_v41 = vpop.f32.mrb[11].mxu1 }
 0x104   :  { %v1560_v43 = vpop.f32.mrb[12].mxu1 }
 0x105   :  { %v1562_v44 = vpop.f32.mrb[13].mxu1 }
 0x108   :  { %v1567_v47 = vpop.f32.mrb[14].mxu1 }
 0x109   :  { %v1569_v48 = vpop.f32.mrb[15].mxu1 }
 0x10c   :  { %v309_v50 = vpop.f32.mrb[0].mxu1 }
 0x10d   :  { %v1234_v51 = vadd.f32 %v309_v50, %v1571_v49  ;;  %v311_v52 = vpop.f32.mrb[1].mxu1 }
 0x10e   :  { %v1235_v56 = vadd.f32 %v311_v52, %v1574_v55 }
 0x10f   :  { %v1083_v53 = vmul.f32 -1.442695, %v1234_v51 }
 0x110   :  { %v1084_v62 = vmul.f32 -1.442695, %v1235_v56 }
 0x111   :  { %1272 = vpow2.f32 %v1083_v53 }
 0x112   :  { %1274 = vtanh.f32 %v1235_v56 }
 0x11b   :  { %v1273_v57 = vpop.eup %1272 }
 0x11c   :  { %v319_v58 = vadd.f32 1.0, %v1273_v57  ;;  %v1275_v59 = vpop.eup %1274 }
 0x11e   :  { %1276 = vrcp.f32 %v319_v58 }
 0x11f   :  { %1278 = vpow2.f32 %v1084_v62 }
 0x128   :  { %v1277_v60 = vpop.eup %1276 }
 0x129   :  { %v330_v61 = vmul.f32 %v1277_v60, %v1275_v59  ;;  %v1279_v63 = vpop.eup %1278  ;;  %v329_v2 = vmul.f32 0.0, %v1277_v60 }
 0x12a   :  { %v326_v1 = vadd.f32 1.0, %v1279_v63 }
 0x12b   :  { %332 = vrot.lane.b32.xlu0 %v330_v61, %s1420_s2 }
 0x12c   :  { %1280 = vrcp.f32 %v326_v1 }
 0x136   :  { %v1281_v5 = vpop.eup %1280 }
 0x19d   :  { %v333_v3 = vpop.permute.xlu0 %332 }
 0x19e   :  { %v335_v4 = vadd.f32 %v333_v3, %v329_v2 }
 0x1a0   :  { %1282 = vtanh.f32 %v335_v4 }
 0x1aa   :  { %v1283_v6 = vpop.eup %1282 }
 0x1ab   :  { %v337_v7 = vmul.f32 %v1283_v6, %v1281_v5  ;;  %v177_v6 = vadd.f32 %v1548_v35, %v1571_v49 }
 0x1ad   :  { %341 = vrot.lane.b32.xlu0 %v337_v7, %s1420_s2  ;;  %v179_v7 = vadd.f32 %v1550_v36, %v1574_v55 }
 0x21f   :  { %v342_v10 = vpop.permute.xlu0 %341 }
 0x220   :  { %1085 = vmatmul.mubr.msk.f32.vlgmr.msra.gmra.mrb[2].mxu1 %vm239_vm2, %v342_v10 }
 0x221   :  { %1141 = vmatpush1.bf16.msra.mxu1 %v1469_v9  ;;  %511 = vmatprep.mubr.f32.mxu1 %v1419_v0 }
 0x222   :  { %1143 = vmatprep.subr.bf16.mxu1 %v1471_v14 }
 0x225   :  { %1145 = vmatpush1.bf16.msra.mxu1 %v1481_v18 }
 0x226   :  { %1147 = vmatprep.subr.bf16.mxu1 %v1484_v19 }
 0x229   :  { %1149 = vmatpush1.bf16.msra.mxu1 %v1494_v25 }
 0x22a   :  { %1151 = vmatprep.subr.bf16.mxu1 %v1497_v26 }
 0x22d   :  { %1153 = vmatpush1.bf16.msra.mxu1 %v1507_v30 }
 0x2f3   :  { %v411_v11 = vpop.f32.mrb[2].mxu1 }
 0x2f4   :  { %v1236_v12 = vadd.f32 %v411_v11, %v1571_v49  ;;  %v413_v13 = vpop.f32.mrb[3].mxu1 }
 0x2f5   :  { %v1237_v16 = vadd.f32 %v413_v13, %v1574_v55 }
 0x2f6   :  { %v1086_v15 = vmul.f32 -1.442695, %v1236_v12 }
 0x2f7   :  { %v1087_v24 = vmul.f32 -1.442695, %v1237_v16 }
 0x2f8   :  { %1284 = vpow2.f32 %v1086_v15 }
 0x2f9   :  { %1286 = vtanh.f32 %v1237_v16 }
 0x302   :  { %v1285_v17 = vpop.eup %1284 }
 0x303   :  { %v421_v20 = vadd.f32 1.0, %v1285_v17  ;;  %v1287_v21 = vpop.eup %1286 }
 0x305   :  { %1288 = vrcp.f32 %v421_v20 }
 0x306   :  { %1290 = vpow2.f32 %v1087_v24 }
 0x30f   :  { %v1289_v22 = vpop.eup %1288 }
 0x310   :  { %v432_v23 = vmul.f32 %v1289_v22, %v1287_v21  ;;  %v1291_v27 = vpop.eup %1290  ;;  %v431_v29 = vmul.f32 %v1289_v22, %v335_v4 }
 0x311   :  { %v428_v28 = vadd.f32 1.0, %v1291_v27 }
 0x312   :  { %434 = vrot.lane.b32.xlu1 %v432_v23, %s1420_s2 }
 0x313   :  { %1292 = vrcp.f32 %v428_v28 }
 0x31d   :  { %v1293_v33 = vpop.eup %1292 }
 0x384   :  { %v435_v31 = vpop.permute.xlu1 %434 }
 0x385   :  { %v437_v32 = vadd.f32 %v435_v31, %v431_v29 }
 0x387   :  { %1294 = vtanh.f32 %v437_v32 }
 0x391   :  { %v1295_v34 = vpop.eup %1294 }
 0x392   :  { %v439_v39 = vmul.f32 %v1295_v34, %v1293_v33  ;;  %v183_v34 = vadd.f32 %v1552_v37, %v1571_v49 }
 0x394   :  { %443 = vrot.lane.b32.xlu1 %v439_v39, %s1420_s2  ;;  %v185_v39 = vadd.f32 %v1554_v38, %v1574_v55 }
 0x406   :  { %v444_v42 = vpop.permute.xlu1 %443 }
 0x407   :  { %1088 = vmatmul.mubr.msk.f32.vlgmr.msra.gmra.mrb[4].mxu1 %vm239_vm2, %v444_v42 }
 0x4da   :  { %v513_v45 = vpop.f32.mrb[4].mxu1 }
 0x4db   :  { %v1238_v46 = vadd.f32 %v513_v45, %v1571_v49  ;;  %v515_v50 = vpop.f32.mrb[5].mxu1 }
 0x4dc   :  { %v1239_v52 = vadd.f32 %v515_v50, %v1574_v55 }
 0x4dd   :  { %v1089_v51 = vmul.f32 -1.442695, %v1238_v46 }
 0x4de   :  { %v1090_v59 = vmul.f32 -1.442695, %v1239_v52 }
 0x4df   :  { %1296 = vpow2.f32 %v1089_v51 }
 0x4e0   :  { %1298 = vtanh.f32 %v1239_v52 }
 0x4e9   :  { %v1297_v53 = vpop.eup %1296 }
 0x4ea   :  { %v523_v54 = vadd.f32 1.0, %v1297_v53  ;;  %v1299_v56 = vpop.eup %1298 }
 0x4ec   :  { %1300 = vrcp.f32 %v523_v54 }
 0x4ed   :  { %1302 = vpow2.f32 %v1090_v59 }
 0x4f6   :  { %v1301_v57 = vpop.eup %1300 }
 0x4f7   :  { %v534_v58 = vmul.f32 %v1301_v57, %v1299_v56  ;;  %v1303_v60 = vpop.eup %1302  ;;  %v533_v62 = vmul.f32 %v1301_v57, %v437_v32 }
 0x4f8   :  { %v530_v61 = vadd.f32 1.0, %v1303_v60 }
 0x4f9   :  { %536 = vrot.lane.b32.xlu0 %v534_v58, %s1420_s2 }
 0x4fa   :  { %1304 = vrcp.f32 %v530_v61 }
 0x504   :  { %v1305_v2 = vpop.eup %1304 }
 0x56b   :  { %v537_v63 = vpop.permute.xlu0 %536 }
 0x56c   :  { %v539_v1 = vadd.f32 %v537_v63, %v533_v62 }
 0x56e   :  { %1306 = vtanh.f32 %v539_v1 }
 0x578   :  { %v1307_v3 = vpop.eup %1306 }
 0x579   :  { %v541_v4 = vmul.f32 %v1307_v3, %v1305_v2  ;;  %v189_v3 = vadd.f32 %v1556_v40, %v1571_v49 }
 0x57b   :  { %545 = vrot.lane.b32.xlu1 %v541_v4, %s1420_s2  ;;  %v191_v4 = vadd.f32 %v1558_v41, %v1574_v55 }
 0x5ed   :  { %v546_v5 = vpop.permute.xlu1 %545 }
 0x5ee   :  { %1091 = vmatmul.mubr.msk.f32.vlgmr.msra.gmra.mrb[0].mxu0 %vm239_vm2, %v546_v5 }
 0x5ef   :  { %1173 = vmatpush1.bf16.msra.mxu0 %v1469_v9  ;;  %715 = vmatprep.mubr.f32.mxu0 %v1419_v0 }
 0x5f0   :  { %1175 = vmatprep.subr.bf16.mxu0 %v1471_v14 }
 0x5f3   :  { %1177 = vmatpush1.bf16.msra.mxu0 %v1481_v18 }
 0x5f4   :  { %1179 = vmatprep.subr.bf16.mxu0 %v1484_v19 }
 0x5f7   :  { %1181 = vmatpush1.bf16.msra.mxu0 %v1494_v25 }
 0x5f8   :  { %1183 = vmatprep.subr.bf16.mxu0 %v1497_v26 }
 0x5fb   :  { %1185 = vmatpush1.bf16.msra.mxu0 %v1507_v30 }
 0x5fc   :  { %1187 = vmatprep.subr.bf16.mxu0 %v1467_v8 }
 0x6c1   :  { %v615_v10 = vpop.f32.mrb[0].mxu0 }
 0x6c2   :  { %v620_v11 = vadd.f32 %v615_v10, %v177_v6  ;;  %v617_v12 = vpop.f32.mrb[1].mxu0 }
 0x6c3   :  { %v621_v13 = vadd.f32 %v617_v12, %v179_v7 }
 0x6c4   :  { %v1092_v15 = vmul.f32 -1.442695, %v620_v11 }
 0x6c5   :  { %v1093_v23 = vmul.f32 -1.442695, %v621_v13 }
 0x6c6   :  { %1308 = vpow2.f32 %v1092_v15 }
 0x6c7   :  { %1310 = vtanh.f32 %v621_v13 }
 0x6d0   :  { %v1309_v16 = vpop.eup %1308 }
 0x6d1   :  { %v625_v17 = vadd.f32 1.0, %v1309_v16  ;;  %v1311_v20 = vpop.eup %1310 }
 0x6d3   :  { %1312 = vrcp.f32 %v625_v17 }
 0x6d4   :  { %1314 = vpow2.f32 %v1093_v23 }
 0x6dd   :  { %v1313_v21 = vpop.eup %1312 }
 0x6de   :  { %v636_v22 = vmul.f32 %v1313_v21, %v1311_v20  ;;  %v1315_v35 = vpop.eup %1314  ;;  %v635_v36 = vmul.f32 %v1313_v21, %v539_v1 }
 0x6df   :  { %v632_v24 = vadd.f32 1.0, %v1315_v35 }
 0x6e0   :  { %638 = vrot.lane.b32.xlu0 %v636_v22, %s1420_s2 }
 0x6e1   :  { %1316 = vrcp.f32 %v632_v24 }
 0x6eb   :  { %v1317_v29 = vpop.eup %1316 }
 0x752   :  { %v639_v27 = vpop.permute.xlu0 %638 }
 0x753   :  { %v641_v28 = vadd.f32 %v639_v27, %v635_v36  ;;  %v195_v27 = vadd.f32 %v1560_v43, %v1571_v49 }
 0x755   :  { %1318 = vtanh.f32 %v641_v28 }
 0x75f   :  { %v1319_v31 = vpop.eup %1318 }
 0x760   :  { %v643_v32 = vmul.f32 %v1319_v31, %v1317_v29 }
 0x762   :  { %647 = vrot.lane.b32.xlu1 %v643_v32, %s1420_s2 }
 0x7d4   :  { %v648_v33 = vpop.permute.xlu1 %647 }
 0x7d5   :  { %1094 = vmatmul.mubr.msk.f32.vlgmr.msra.gmra.mrb[2].mxu0 %vm239_vm2, %v648_v33 }
 0x7d6   :  { %1189 = vmatpush1.bf16.msra.mxu0 %v1469_v9  ;;  %817 = vmatprep.mubr.f32.mxu0 %v1419_v0 }
 0x7d7   :  { %1191 = vmatprep.subr.bf16.mxu0 %v1471_v14 }
 0x7da   :  { %1193 = vmatpush1.bf16.msra.mxu0 %v1481_v18 }
 0x7db   :  { %1195 = vmatprep.subr.bf16.mxu0 %v1484_v19 }
 0x7de   :  { %1197 = vmatpush1.bf16.msra.mxu0 %v1494_v25 }
 0x7df   :  { %1199 = vmatprep.subr.bf16.mxu0 %v1497_v26 }
 0x7e2   :  { %1201 = vmatpush1.bf16.msra.mxu0 %v1507_v30 }
 0x7e3   :  { %1203 = vmatprep.subr.bf16.mxu0 %v1467_v8 }
 0x8a8   :  { %v717_v42 = vpop.f32.mrb[2].mxu0 }
 0x8a9   :  { %v722_v45 = vadd.f32 %v717_v42, %v183_v34  ;;  %v719_v46 = vpop.f32.mrb[3].mxu0 }
 0x8aa   :  { %v723_v50 = vadd.f32 %v719_v46, %v185_v39 }
 0x8ab   :  { %v1095_v51 = vmul.f32 -1.442695, %v722_v45 }
 0x8ac   :  { %v1096_v58 = vmul.f32 -1.442695, %v723_v50 }
 0x8ad   :  { %1320 = vpow2.f32 %v1095_v51  ;;  %v201_v51 = vadd.f32 %v1567_v47, %v1571_v49 }
 0x8ae   :  { %1322 = vtanh.f32 %v723_v50 }
 0x8b7   :  { %v1321_v52 = vpop.eup %1320 }
 0x8b8   :  { %v727_v53 = vadd.f32 1.0, %v1321_v52  ;;  %v1323_v54 = vpop.eup %1322  ;;  %v203_v52 = vadd.f32 %v1569_v48, %v1574_v55 }
 0x8ba   :  { %1324 = vrcp.f32 %v727_v53 }
 0x8bb   :  { %1326 = vpow2.f32 %v1096_v58 }
 0x8c4   :  { %v1325_v56 = vpop.eup %1324 }
 0x8c5   :  { %v738_v57 = vmul.f32 %v1325_v56, %v1323_v54  ;;  %v1327_v37 = vpop.eup %1326  ;;  %v737_v38 = vmul.f32 %v1325_v56, %v641_v28 }
 0x8c6   :  { %v734_v59 = vadd.f32 1.0, %v1327_v37 }
 0x8c7   :  { %740 = vrot.lane.b32.xlu0 %v738_v57, %s1420_s2 }
 0x8c8   :  { %1328 = vrcp.f32 %v734_v59 }
 0x8d2   :  { %v1329_v62 = vpop.eup %1328 }
 0x939   :  { %v741_v60 = vpop.permute.xlu0 %740 }
 0x93a   :  { %v743_v61 = vadd.f32 %v741_v60, %v737_v38 }
 0x93c   :  { %1330 = vtanh.f32 %v743_v61 }
 0x946   :  { %v1331_v63 = vpop.eup %1330 }
 0x947   :  { %v745_v1 = vmul.f32 %v1331_v63, %v1329_v62 }
 0x949   :  { %749 = vrot.lane.b32.xlu1 %v745_v1, %s1420_s2 }
 0x9bb   :  { %v750_v2 = vpop.permute.xlu1 %749 }
 0x9bc   :  { %1097 = vmatmul.mubr.msk.f32.vlgmr.msra.gmra.mrb[4].mxu0 %vm239_vm2, %v750_v2 }
 0x9bd   :  { %1205 = vmatpush1.bf16.msra.mxu0 %v1469_v9  ;;  %919 = vmatprep.mubr.f32.mxu0 %v1419_v0 }
 0x9be   :  { %1207 = vmatprep.subr.bf16.mxu0 %v1471_v14 }
 0x9c1   :  { %1209 = vmatpush1.bf16.msra.mxu0 %v1481_v18 }
 0x9c2   :  { %1211 = vmatprep.subr.bf16.mxu0 %v1484_v19 }
 0x9c5   :  { %1213 = vmatpush1.bf16.msra.mxu0 %v1494_v25 }
 0x9c6   :  { %1215 = vmatprep.subr.bf16.mxu0 %v1497_v26 }
 0x9c9   :  { %1217 = vmatpush1.bf16.msra.mxu0 %v1507_v30 }
 0x9ca   :  { %1219 = vmatprep.subr.bf16.mxu0 %v1467_v8 }
 0xa8f   :  { %v819_v5 = vpop.f32.mrb[4].mxu0 }
 0xa90   :  { %v824_v6 = vadd.f32 %v819_v5, %v189_v3  ;;  %v821_v7 = vpop.f32.mrb[5].mxu0 }
 0xa91   :  { %v825_v10 = vadd.f32 %v821_v7, %v191_v4 }
 0xa92   :  { %v1098_v11 = vmul.f32 -1.442695, %v824_v6 }
 0xa93   :  { %v1099_v8 = vmul.f32 -1.442695, %v825_v10 }
 0xa94   :  { %1332 = vpow2.f32 %v1098_v11 }
 0xa95   :  { %1334 = vtanh.f32 %v825_v10 }
 0xa9e   :  { %v1333_v12 = vpop.eup %1332 }
 0xa9f   :  { %v829_v13 = vadd.f32 1.0, %v1333_v12  ;;  %v1335_v15 = vpop.eup %1334 }
 0xaa1   :  { %1336 = vrcp.f32 %v829_v13 }
 0xaa2   :  { %1338 = vpow2.f32 %v1099_v8 }
 0xaab   :  { %v1337_v16 = vpop.eup %1336 }
 0xaac   :  { %v840_v17 = vmul.f32 %v1337_v16, %v1335_v15  ;;  %v1339_v40 = vpop.eup %1338  ;;  %v839_v41 = vmul.f32 %v1337_v16, %v743_v61 }
 0xaad   :  { %v836_v20 = vadd.f32 1.0, %v1339_v40 }
 0xaae   :  { %842 = vrot.lane.b32.xlu0 %v840_v17, %s1420_s2 }
 0xaaf   :  { %1340 = vrcp.f32 %v836_v20 }
 0xab9   :  { %v1341_v23 = vpop.eup %1340 }
 0xb20   :  { %v843_v21 = vpop.permute.xlu0 %842 }
 0xb21   :  { %v845_v22 = vadd.f32 %v843_v21, %v839_v41 }
 0xb23   :  { %1342 = vtanh.f32 %v845_v22 }
 0xb2d   :  { %v1343_v35 = vpop.eup %1342 }
 0xb2e   :  { %v847_v24 = vmul.f32 %v1343_v35, %v1341_v23 }
 0xb30   :  { %851 = vrot.lane.b32.xlu1 %v847_v24, %s1420_s2 }
 0xba2   :  { %v852_v36 = vpop.permute.xlu1 %851 }
 0xba3   :  { %1100 = vmatmul.mubr.msk.f32.vlgmr.msra.gmra.mrb[6].mxu0 %vm239_vm2, %v852_v36 }
 0xba4   :  { %1221 = vmatpush1.bf16.msra.mxu0 %v1469_v9  ;;  %1021 = vmatprep.mubr.f32.mxu0 %v1419_v0  ;;  %v197_v9 = vadd.f32 %v1562_v44, %v1574_v55 }
 0xba5   :  { %1223 = vmatprep.subr.bf16.mxu0 %v1471_v14 }
 0xba8   :  { %1225 = vmatpush1.bf16.msra.mxu0 %v1481_v18 }
 0xba9   :  { %1227 = vmatprep.subr.bf16.mxu0 %v1484_v19 }
 0xbac   :  { %1229 = vmatpush1.bf16.msra.mxu0 %v1494_v25 }
 0xbad   :  { %1231 = vmatprep.subr.bf16.mxu0 %v1497_v26 }
 0xbb0   :  { %1233 = vmatpush1.bf16.msra.mxu0 %v1507_v30 }
 0xc76   :  { %v921_v28 = vpop.f32.mrb[6].mxu0 }
 0xc77   :  { %v926_v0 = vadd.f32 %v921_v28, %v195_v27  ;;  %v923_v29 = vpop.f32.mrb[7].mxu0 }
 0xc78   :  { %v927_v14 = vadd.f32 %v923_v29, %v197_v9 }
 0xc79   :  { %v1101_v31 = vmul.f32 -1.442695, %v926_v0 }
 0xc7a   :  { %v1102_v30 = vmul.f32 -1.442695, %v927_v14 }
 0xc7b   :  { %1344 = vpow2.f32 %v1101_v31 }
 0xc7c   :  { %1346 = vtanh.f32 %v927_v14 }
 0xc85   :  { %v1345_v18 = vpop.eup %1344 }
 0xc86   :  { %v931_v19 = vadd.f32 1.0, %v1345_v18  ;;  %v1347_v25 = vpop.eup %1346 }
 0xc88   :  { %1348 = vrcp.f32 %v931_v19 }
 0xc89   :  { %1350 = vpow2.f32 %v1102_v30 }
 0xc92   :  { %v1349_v26 = vpop.eup %1348 }
 0xc93   :  { %v942_v32 = vmul.f32 %v1349_v26, %v1347_v25  ;;  %v1351_v43 = vpop.eup %1350  ;;  %v941_v44 = vmul.f32 %v1349_v26, %v845_v22 }
 0xc94   :  { %v938_v33 = vadd.f32 1.0, %v1351_v43 }
 0xc95   :  { %944 = vrot.lane.b32.xlu0 %v942_v32, %s1420_s2 }
 0xc96   :  { %1352 = vrcp.f32 %v938_v33 }
 0xca0   :  { %v1353_v42 = vpop.eup %1352 }
 0xd07   :  { %v945_v34 = vpop.permute.xlu0 %944 }
 0xd08   :  { %v947_v39 = vadd.f32 %v945_v34, %v941_v44 }
 0xd0a   :  { %1354 = vtanh.f32 %v947_v39 }
 0xd14   :  { %v1355_v45 = vpop.eup %1354 }
 0xd15   :  { %v949_v46 = vmul.f32 %v1355_v45, %v1353_v42 }
 0xd17   :  { %953 = vrot.lane.b32.xlu1 %v949_v46, %s1420_s2 }
 0xd89   :  { %v954_v50 = vpop.permute.xlu1 %953 }
 0xd8a   :  { %1103 = vmatmul.mubr.msk.f32.vlgmr.msra.gmra.mrb[8].mxu0 %vm239_vm2, %v954_v50 }
 0xe5d   :  { %v1023_v53 = vpop.f32.mrb[8].mxu0 }
 0xe5e   :  { %v1028_v54 = vadd.f32 %v1023_v53, %v201_v51  ;;  %v1025_v56 = vpop.f32.mrb[9].mxu0 }
 0xe5f   :  { %v1029_v57 = vadd.f32 %v1025_v56, %v203_v52 }
 0xe60   :  { %v1104_v58 = vmul.f32 -1.442695, %v1028_v54 }
 0xe61   :  { %v1105_v62 = vmul.f32 -1.442695, %v1029_v57 }
 0xe62   :  { %1356 = vpow2.f32 %v1104_v58 }
 0xe63   :  { %1358 = vtanh.f32 %v1029_v57 }
 0xe6c   :  { %v1357_v37 = vpop.eup %1356 }
 0xe6d   :  { %v1033_v59 = vadd.f32 1.0, %v1357_v37  ;;  %v1359_v38 = vpop.eup %1358 }
 0xe6f   :  { %1360 = vrcp.f32 %v1033_v59 }
 0xe70   :  { %1362 = vpow2.f32 %v1105_v62 }
 0xe79   :  { %v1361_v60 = vpop.eup %1360 }
 0xe7a   :  { %v1044_v61 = vmul.f32 %v1361_v60, %v1359_v38  ;;  %v1363_v47 = vpop.eup %1362  ;;  %v1043_v48 = vmul.f32 %v1361_v60, %v947_v39 }
 0xe7b   :  { %v1040_v49 = vadd.f32 1.0, %v1363_v47 }
 0xe7c   :  { %1046 = vrot.lane.b32.xlu0 %v1044_v61, %s1420_s2 }
 0xe7d   :  { %1364 = vrcp.f32 %v1040_v49 }
 0xe87   :  { %v1365_v1 = vpop.eup %1364 }
 0xeee   :  { %v1047_v55 = vpop.permute.xlu0 %1046 }
 0xeef   :  { %v1049_v63 = vadd.f32 %v1047_v55, %v1043_v48 }
 0xef1   :  { %1366 = vtanh.f32 %v1049_v63 }
 0xefb   :  { %v1367_v2 = vpop.eup %1366 }
 0xefc   :  { %v1051_v3 = vmul.f32 %v1367_v2, %v1365_v1 }
 0xefe   :  { %1053 = vrot.lane.b32.xlu1 %v1051_v3, %s1420_s2 }
 0xf70   :  { %v1054_v4 = vpop.permute.xlu1 %1053 }
 0xf71   :  { %1056 = vst.msk [vmem:[#allocation6] sm:$0xff] %vm239_vm2, %v1054_v4 }
 0xf72   :  { %1401 = shalt.err (!%p1398_p12)
}
 0xf73   :  { %s1402_s25 = scalar_lea.hbm %s1684_s4, 128 }
 0xf74   :  { %p1403_p13 = scmp.ne.s32.totalorder %s1684_s4, %s1402_s25  ;;  %p1406_p0 = scmp.lt.u32.totalorder %s1402_s25, %s1684_s4 }
 0xf76   :  { %p1408_p1 = pnand %p1406_p0, %p1403_p13 }
 0xf78   :  { %1411 = shalt.err (!%p1408_p1)
}
 0xf79   :  { %1066 = dma.vmem_to_hbm [thread:$0]  %s1064_s21, 128, %s1684_s4, [#allocation5]  }
 0xf7a   :  { %1414 = dma.done.wait [#allocation5], 128  }
 0xf7b   :  { %1415 = vsyncadd [#allocation5], 4294967168 }
 0xf7c   :  { %1070 = vsyncpa [#allocation4], 1 }
 0xf7d   :  { %1071 = vsyncpa [#allocation5], 1 }

</bundles_post_ra>
